<compile_context>
chip_gen: v5e
topology: v5e:2x2
jax: 0.10.0
libtpu: 0.0.40
codegen_flags: <defaults>
</compile_context>

<pallas_src>
import jax
import jax.numpy as jnp
from jax.experimental import pallas as pl
from jax.experimental.pallas import tpu as pltpu


def _bbox_pool_matmul_kernel(x_ref, w_ref, b_ref, o_ref):
    # x_ref: (TN, C, HW) input dtype; w_ref: (C, OP) f32 (1/HW pre-folded);
    # b_ref: (1, OP) f32; o_ref: (TN, OP) f32.
    x = x_ref[...].astype(jnp.float32)          # cast post-DMA (no-op for f32)
    pooled = jnp.sum(x, axis=-1)                # XLU lane-reduce -> (TN, C)
    o_ref[...] = jnp.dot(pooled, w_ref[...],
                         preferred_element_type=jnp.float32) + b_ref[...]


def _bbox_matmul_kernel(x_ref, w_ref, b_ref, o_ref):
    # x_ref: (TN, C); w_ref: (C, OP) f32; b_ref: (1, OP) f32; o_ref: (TN, OP).
    x = x_ref[...].astype(jnp.float32)
    o_ref[...] = jnp.dot(x, w_ref[...],
                         preferred_element_type=jnp.float32) + b_ref[...]


def bbox_regressor_forward(x, w, b, bn_gamma, bn_beta,
                           bn_mean=None, bn_var=None, eps=1e-5):
    """x: (N, C, H, W) or (N, C). Returns (N, 4*num_classes) float32."""
    # --- Shape normalization (NCHW reshapes are contiguous => free). -------
    if x.ndim == 4:
        N, C, H, W = x.shape
        HW = H * W                              # HW == 1 means "no pooling"
    else:
        N, C = x.shape
        HW = 1

    O = w.shape[0]                              # 4 * num_classes
    if bn_mean is None:
        bn_mean = jnp.zeros((O,), jnp.float32)
    if bn_var is None:
        bn_var = jnp.ones((O,), jnp.float32)

    # --- Fold BN (eval) + Linear bias (+ 1/HW) into weight / bias. ---------
    scale = (bn_gamma.astype(jnp.float32) /
             jnp.sqrt(bn_var.astype(jnp.float32) + eps))            # (O,)
    w_eff = w.T.astype(jnp.float32) * scale[None, :]                # (C, O)
    bias_eff = ((b.astype(jnp.float32) - bn_mean.astype(jnp.float32)) * scale
                + bn_beta.astype(jnp.float32))                      # (O,)
    if HW > 1:
        w_eff = w_eff / HW      # kernel only sums over HW; mean folded here

    # --- Pad output channels to a full 128-lane tile (unmasked stores). ----
    OP = 128 * pl.cdiv(O, 128)
    if OP != O:
        w_eff = jnp.pad(w_eff, ((0, 0), (0, OP - O)))
        bias_eff = jnp.pad(bias_eff, (0, OP - O))
    b2 = bias_eff.reshape(1, OP)

    # --- Tile N so double-buffered x tiles stay well under VMEM. -----------
    row_bytes = C * HW * x.dtype.itemsize
    tn = (8 * 1024 * 1024) // max(1, row_bytes)     # ~8 MiB per x buffer
    tn = max(8, min(512, (tn // 8) * 8))            # multiple of 8, capped
    TN = N if N <= tn else tn                       # TN == N is always legal
    grid = (pl.cdiv(N, TN),)

    cparams = pltpu.CompilerParams(
        dimension_semantics=("parallel",),
        vmem_limit_bytes=32 * 1024 * 1024,
    )

    if HW > 1:
        x3 = x.reshape(N, C, HW)                    # free reshape, no transpose
        out = pl.pallas_call(
            _bbox_pool_matmul_kernel,
            out_shape=jax.ShapeDtypeStruct((N, OP), jnp.float32),
            grid_spec=pltpu.PrefetchScalarGridSpec(
                num_scalar_prefetch=0,
                grid=grid,
                in_specs=[
                    pl.BlockSpec((TN, C, HW), lambda i: (i, 0, 0)),  # pipelined
                    pl.BlockSpec((C, OP), lambda i: (0, 0)),         # resident
                    pl.BlockSpec((1, OP), lambda i: (0, 0)),         # resident
                ],
                out_specs=pl.BlockSpec((TN, OP), lambda i: (i, 0)),
            ),
            compiler_params=cparams,
        )(x3, w_eff, b2)
    else:
        x2 = x.reshape(N, C)
        out = pl.pallas_call(
            _bbox_matmul_kernel,
            out_shape=jax.ShapeDtypeStruct((N, OP), jnp.float32),
            grid_spec=pltpu.PrefetchScalarGridSpec(
                num_scalar_prefetch=0,
                grid=grid,
                in_specs=[
                    pl.BlockSpec((TN, C), lambda i: (i, 0)),         # pipelined
                    pl.BlockSpec((C, OP), lambda i: (0, 0)),         # resident
                    pl.BlockSpec((1, OP), lambda i: (0, 0)),         # resident
                ],
                out_specs=pl.BlockSpec((TN, OP), lambda i: (i, 0)),
            ),
            compiler_params=cparams,
        )(x2, w_eff, b2)

    return out[:, :O] if OP != O else out


if __name__ == "__main__":
    key = jax.random.PRNGKey(0)
    k_x, k_w, k_g, k_x2 = jax.random.split(key, 4)

    # Small shapes consistent with the module.
    N, C, H, W = 8, 32, 16, 16
    num_classes = 2
    O = 4 * num_classes

    x = jax.random.normal(k_x, (N, C, H, W), jnp.float32)

    # Deterministic parameter init mirroring __init__:
    #   Linear.weight ~ N(0, 0.01), Linear.bias = 0
    #   BN.weight ~ N(0, 0.01),     BN.bias = 0, running_mean=0, running_var=1
    w = 0.01 * jax.random.normal(k_w, (O, C), jnp.float32)
    b = jnp.zeros((O,), jnp.float32)
    bn_gamma = 0.01 * jax.random.normal(k_g, (O,), jnp.float32)
    bn_beta = jnp.zeros((O,), jnp.float32)

    # --- Path 1: spatial input (pooling fused inside the kernel). ----------
    out = bbox_regressor_forward(x, w, b, bn_gamma, bn_beta)
    out = jax.block_until_ready(out)

    pooled_ref = jnp.mean(x, axis=(2, 3))
    lin_ref = pooled_ref @ w.T + b
    ref = lin_ref * (bn_gamma / jnp.sqrt(1.0 + 1e-5)) + bn_beta
    assert out.shape == (N, O)
    assert jnp.allclose(out, ref, atol=1e-5, rtol=1e-4)

    # --- Path 2: already-flat (N, C) input (pure matmul path). -------------
    x_flat = jax.random.normal(k_x2, (N, C), jnp.float32)
    out2 = bbox_regressor_forward(x_flat, w, b, bn_gamma, bn_beta)
    out2 = jax.block_until_ready(out2)
    ref2 = (x_flat @ w.T + b) * (bn_gamma / jnp.sqrt(1.0 + 1e-5)) + bn_beta
    assert out2.shape == (N, O)
    assert jnp.allclose(out2, ref2, atol=1e-5, rtol=1e-4)

    print("KERNEL_OK")
</pallas_src>

<mosaic_0001>
module attributes {stable_mosaic.version = 11 : i64} {
  func.func @_bbox_pool_matmul_kernel(%arg0: i32, %arg1: memref<8x32x256xf32, #tpu.memory_space<vmem>>, %arg2: memref<32x128xf32, #tpu.memory_space<vmem>>, %arg3: memref<1x128xf32, #tpu.memory_space<vmem>>, %arg4: memref<8x128xf32, #tpu.memory_space<vmem>>) attributes {dimension_semantics = [#tpu.dimension_semantics<parallel>], iteration_bounds = array<i64: 1>, scalar_prefetch = 0 : i64, scratch_operands = 0 : i64, tpu.core_type = #tpu.core_type<tc>, window_params = [{transform_indices = @transform_0, window_bounds = array<i64: 8, 32, 256>}, {pipeline_mode = #tpu.pipeline_mode<synchronous>, transform_indices = @transform_1, window_bounds = array<i64: 32, 128>}, {pipeline_mode = #tpu.pipeline_mode<synchronous>, transform_indices = @transform_2, window_bounds = array<i64: 1, 128>}, {transform_indices = @transform_3, window_bounds = array<i64: 8, 128>}]} {
    %c0 = arith.constant 0 : index
    %c0_0 = arith.constant 0 : index
    %c0_1 = arith.constant 0 : index
    %0 = vector.load %arg1[%c0, %c0_0, %c0_1] : memref<8x32x256xf32, #tpu.memory_space<vmem>>, vector<8x32x256xf32>
    %cst = arith.constant dense<0.000000e+00> : vector<8x32xf32>
    %1 = vector.multi_reduction <add>, %0, %cst [2] : vector<8x32x256xf32> to vector<8x32xf32>
    %c0_2 = arith.constant 0 : index
    %c0_3 = arith.constant 0 : index
    %2 = vector.load %arg2[%c0_2, %c0_3] : memref<32x128xf32, #tpu.memory_space<vmem>>, vector<32x128xf32>
    %cst_4 = arith.constant dense<0.000000e+00> : vector<8x128xf32>
    %3 = tpu.matmul %1, %2, %cst_4 {dimension_numbers = #tpu.dot_dimension_numbers<[1], [0], [0], [1], [0, 0, 1, 1], [], []>} : vector<8x32xf32>, vector<32x128xf32>, vector<8x128xf32> -> vector<8x128xf32>
    %c0_5 = arith.constant 0 : index
    %c0_6 = arith.constant 0 : index
    %4 = vector.load %arg3[%c0_5, %c0_6] : memref<1x128xf32, #tpu.memory_space<vmem>>, vector<1x128xf32>
    %5 = vector.broadcast %4 : vector<1x128xf32> to vector<8x128xf32>
    %6 = arith.addf %3, %5 : vector<8x128xf32>
    %c0_7 = arith.constant 0 : index
    %c0_8 = arith.constant 0 : index
    %7 = vector.load %arg4[%c0_7, %c0_8] : memref<8x128xf32, #tpu.memory_space<vmem>>, vector<8x128xf32>
    tpu.vector_store %arg4[%c0_7, %c0_8], %6 {strides = array<i32>} : memref<8x128xf32, #tpu.memory_space<vmem>>, vector<8x128xf32>,
    return
  }
  func.func @transform_0(%arg0: i32) -> (i32, i32, i32) {
    %c0_i32 = arith.constant 0 : i32
    %c0_i32_0 = arith.constant 0 : i32
    %c0_i32_1 = arith.constant 0 : i32
    return %arg0, %c0_i32, %c0_i32_0 : i32, i32, i32
  }
  func.func @transform_1(%arg0: i32) -> (i32, i32) {
    %c0_i32 = arith.constant 0 : i32
    %c0_i32_0 = arith.constant 0 : i32
    %c0_i32_1 = arith.constant 0 : i32
    return %c0_i32, %c0_i32_0 : i32, i32
  }
  func.func @transform_2(%arg0: i32) -> (i32, i32) {
    %c0_i32 = arith.constant 0 : i32
    %c0_i32_0 = arith.constant 0 : i32
    %c0_i32_1 = arith.constant 0 : i32
    return %c0_i32, %c0_i32_0 : i32, i32
  }
  func.func @transform_3(%arg0: i32) -> (i32, i32) {
    %c0_i32 = arith.constant 0 : i32
    %c0_i32_0 = arith.constant 0 : i32
    return %arg0, %c0_i32 : i32, i32
  }
}

</mosaic_0001>

<bundles_post_ra>
// kernel: tpu_custom_call.1
= control target key start
LH: loop header
LB: loop body
LE: loop exit
PB: predicated region body
PF: predicated region fallthrough
CT: control target
= control target key end

     0   :  { %8 = vsyncpa [#allocation3], 0  ;;  %s562_s0 = inlined_call_operand.hbm [shape: f32[8,32,256], index: 0, kind: input, shape index: {}]   ;;  %s563_s1 = inlined_call_operand.hbm [shape: f32[32,128], index: 1, kind: input, shape index: {}]   ;;  %s564_s2 = inlined_call_operand.vmem [shape: f32[1,128], index: 2, kind: input, shape index: {}]   ;;  %s565_s3 = inlined_call_operand.hbm [shape: f32[8,128], index: 3, kind: output, shape index: {}]  }
   0x1   :  { %9 = vsyncpa [#allocation6], 0 }
   0x2   :  { %10 = vsyncpa [#allocation4], 0  ;;  %s15_s14 = sshll.u32 %s562_s0, 4  ;;  %s454_s15 = smov [#allocation2]   ;;  %s16_s14 = int_to_ptr.hbm [resolvable:$true] %s15_s14 }
   0x3   :  { %s17_s16 = sshll.u32 %s454_s15, 4  ;;  %s28_s19 = sshll.u32 %s563_s1, 4  ;;  %s18_s16 = int_to_ptr.vmem [resolvable:$true] %s17_s16  ;;  %s29_s19 = int_to_ptr.hbm [resolvable:$true] %s28_s19 }
   0x4   :  { %s455_s20 = smov 256   ;;  %s456_s21 = smov 16  }
   0x5   :  { %23 = dma.hbm_to_vmem [thread:$0]  %s16_s14, 8192, %s18_s16, [#allocation3], %s455_s20, %s455_s20, %s456_s21  }
   0x6   :  { %s457_s22 = smov [#allocation5]   ;;  %s458_s24 = smov 128  }
   0x7   :  { %s30_s23 = sshll.u32 %s457_s22, 4  ;;  %s459_s25 = smov 8   ;;  %s31_s23 = int_to_ptr.vmem [resolvable:$true] %s30_s23 }
   0x8   :  { %36 = dma.hbm_to_vmem [thread:$0]  %s29_s19, 512, %s31_s23, [#allocation6], %s458_s24, %s458_s24, %s459_s25  }
   0x9   :  { %448 = dma.done.wait [#allocation3], 8192  }
   0xa   :  { %449 = vsyncadd [#allocation3], 4294959104 }
   0xb   :  { %450 = dma.done.wait [#allocation6], 512  }
   0xc   :  { %451 = vsyncadd [#allocation6], 4294966784  ;;  %v55_v0 = vld [vmem:[#allocation2 + $0x40] sm:$0xff]  ;;  %v56_v1 = vld [vmem:[#allocation2 + $0x48] sm:$0xff]  ;;  %vm252_vm0 = vcmask 130112   ;;  %vm256_vm1 = vcmask 195712  }
   0xd   :  { %v51_v2 = vld [vmem:[#allocation2 + $0x20] sm:$0xff]  ;;  %v123_v3 = vadd.f32 %v56_v1, %v55_v0  ;;  %v52_v4 = vld [vmem:[#allocation2 + $0x28] sm:$0xff]  ;;  %v57_v9 = vld [vmem:[#allocation2 + $0x50] sm:$0xff]  ;;  %vm260_vm2 = vcmask 261312   ;;  %vm311_vm3 = vcmask 1041409   ;;  %vm313_vm4 = vcmask 1042434  }
   0xe   :  { %v47_v5 = vld [vmem:[#allocation2] sm:$0xff]  ;;  %v48_v6 = vld [vmem:[#allocation2 + $0x8] sm:$0xff]  ;;  %v117_v7 = vadd.f32 %v52_v4, %v51_v2  ;;  %v58_v10 = vld [vmem:[#allocation2 + $0x58] sm:$0xff]  ;;  %vm315_vm5 = vcmask 1043459   ;;  %vm317_vm6 = vcmask 1044484   ;;  %vm319_vm7 = vcmask 1045509  }
   0xf   :  { %v111_v8 = vadd.f32 %v48_v6, %v47_v5  ;;  %124 = vadd.xlane.f32.xlu1 %v123_v3  ;;  %v59_v11 = vld [vmem:[#allocation2 + $0x60] sm:$0xff]  ;;  %v60_v12 = vld [vmem:[#allocation2 + $0x68] sm:$0xff]  ;;  %v49_v13 = vld [vmem:[#allocation2 + $0x10] sm:$0xff]  ;;  %v126_v15 = vadd.f32 %v58_v10, %v57_v9  ;;  %vm321_vm8 = vcmask 1046534   ;;  %vm323_vm9 = vcmask 1047559   ;;  %s460_s26 = smov [#allocation7]  }
  0x10   :  { %118 = vadd.xlane.f32.xlu2 %v117_v7  ;;  %v50_v14 = vld [vmem:[#allocation2 + $0x18] sm:$0xff]  ;;  %v129_v16 = vadd.f32 %v60_v12, %v59_v11  ;;  %v65_v18 = vld [vmem:[#allocation2 + $0x90] sm:$0xff]  ;;  %v63_v22 = vld [vmem:[#allocation2 + $0x80] sm:$0xff]  ;;  %vm325_vm10 = vcmask 261120   ;;  %s354_s27 = sshll.u32 %s460_s26, 4  ;;  %s356_s30 = sshll.u32 %s565_s3, 4  ;;  %s355_s27 = int_to_ptr.vmem [resolvable:$true] %s354_s27  ;;  %s357_s30 = int_to_ptr.hbm [resolvable:$true] %s356_s30 }
  0x11   :  { %112 = vadd.xlane.f32.xlu0 %v111_v8  ;;  %v114_v17 = vadd.f32 %v50_v14, %v49_v13  ;;  %v66_v19 = vld [vmem:[#allocation2 + $0x98] sm:$0xff]  ;;  %v53_v20 = vld [vmem:[#allocation2 + $0x30] sm:$0xff]  ;;  %v64_v23 = vld [vmem:[#allocation2 + $0x88] sm:$0xff] }
  0x12   :  { %v54_v21 = vld [vmem:[#allocation2 + $0x38] sm:$0xff]  ;;  %v138_v24 = vadd.f32 %v66_v19, %v65_v18  ;;  %v135_v26 = vadd.f32 %v64_v23, %v63_v22  ;;  %v67_v27 = vld [vmem:[#allocation2 + $0xa0] sm:$0xff]  ;;  %v68_v28 = vld [vmem:[#allocation2 + $0xa8] sm:$0xff] }
  0x13   :  { %v120_v25 = vadd.f32 %v54_v21, %v53_v20  ;;  %v71_v29 = vld [vmem:[#allocation2 + $0xc0] sm:$0xff]  ;;  %v72_v30 = vld [vmem:[#allocation2 + $0xc8] sm:$0xff]  ;;  %v61_v31 = vld [vmem:[#allocation2 + $0x70] sm:$0xff]  ;;  %v141_v33 = vadd.f32 %v68_v28, %v67_v27 }
  0x14   :  { %v62_v32 = vld [vmem:[#allocation2 + $0x78] sm:$0xff]  ;;  %v147_v34 = vadd.f32 %v72_v30, %v71_v29  ;;  %v69_v36 = vld [vmem:[#allocation2 + $0xb0] sm:$0xff]  ;;  %v75_v38 = vld [vmem:[#allocation2 + $0xe0] sm:$0xff] }
  0x15   :  { %v132_v35 = vadd.f32 %v62_v32, %v61_v31  ;;  %v70_v37 = vld [vmem:[#allocation2 + $0xb8] sm:$0xff]  ;;  %v76_v39 = vld [vmem:[#allocation2 + $0xe8] sm:$0xff]  ;;  %v73_v40 = vld [vmem:[#allocation2 + $0xd0] sm:$0xff]  ;;  %v247_v32 = vlaneseq }
  0x16   :  { %v74_v41 = vld [vmem:[#allocation2 + $0xd8] sm:$0xff]  ;;  %v144_v42 = vadd.f32 %v70_v37, %v69_v36  ;;  %v153_v43 = vadd.f32 %v76_v39, %v75_v38  ;;  %v81_v45 = vld [vmem:[#allocation2 + $0x110] sm:$0xff]  ;;  %v79_v49 = vld [vmem:[#allocation2 + $0x100] sm:$0xff] }
  0x17   :  { %127 = vadd.xlane.f32.xlu1 %v126_v15  ;;  %v150_v44 = vadd.f32 %v74_v41, %v73_v40  ;;  %v82_v46 = vld [vmem:[#allocation2 + $0x118] sm:$0xff]  ;;  %v77_v47 = vld [vmem:[#allocation2 + $0xf0] sm:$0xff]  ;;  %v80_v50 = vld [vmem:[#allocation2 + $0x108] sm:$0xff]  ;;  %v487_v36 = vand.u32 127, %v247_v32 }
  0x18   :  { %130 = vadd.xlane.f32.xlu2 %v129_v16  ;;  %v78_v48 = vld [vmem:[#allocation2 + $0xf8] sm:$0xff]  ;;  %v162_v51 = vadd.f32 %v82_v46, %v81_v45  ;;  %v159_v53 = vadd.f32 %v80_v50, %v79_v49  ;;  %v87_v54 = vld [vmem:[#allocation2 + $0x140] sm:$0xff]  ;;  %v88_v55 = vld [vmem:[#allocation2 + $0x148] sm:$0xff] }
  0x19   :  { %115 = vadd.xlane.f32.xlu0 %v114_v17  ;;  %v156_v52 = vadd.f32 %v78_v48, %v77_v47  ;;  %v89_v56 = vld [vmem:[#allocation2 + $0x150] sm:$0xff]  ;;  %v90_v57 = vld [vmem:[#allocation2 + $0x158] sm:$0xff]  ;;  %v83_v58 = vld [vmem:[#allocation2 + $0x120] sm:$0xff]  ;;  %v171_v60 = vadd.f32 %v88_v55, %v87_v54  ;;  %v490_v37 = vadd.s32 4294967280, %v487_v36  ;;  %v493_v38 = vadd.s32 4294967288, %v487_v36 }
  0x1a   :  { %v84_v59 = vld [vmem:[#allocation2 + $0x128] sm:$0xff]  ;;  %v174_v61 = vadd.f32 %v90_v57, %v89_v56  ;;  %v91_v63 = vld [vmem:[#allocation2 + $0x160] sm:$0xff]  ;;  %v85_v3 = vld [vmem:[#allocation2 + $0x130] sm:$0xff] }
  0x1b   :  { %v165_v62 = vadd.f32 %v84_v59, %v83_v58  ;;  %v92_v0 = vld [vmem:[#allocation2 + $0x168] sm:$0xff]  ;;  %v95_v1 = vld [vmem:[#allocation2 + $0x180] sm:$0xff]  ;;  %v86_v4 = vld [vmem:[#allocation2 + $0x138] sm:$0xff] }
  0x1c   :  { %v96_v2 = vld [vmem:[#allocation2 + $0x188] sm:$0xff]  ;;  %v177_v5 = vadd.f32 %v92_v0, %v91_v63  ;;  %v168_v7 = vadd.f32 %v86_v4, %v85_v3  ;;  %v93_v8 = vld [vmem:[#allocation2 + $0x170] sm:$0xff]  ;;  %v94_v9 = vld [vmem:[#allocation2 + $0x178] sm:$0xff] }
  0x1d   :  { %v183_v6 = vadd.f32 %v96_v2, %v95_v1  ;;  %v99_v10 = vld [vmem:[#allocation2 + $0x1a0] sm:$0xff]  ;;  %v100_v11 = vld [vmem:[#allocation2 + $0x1a8] sm:$0xff]  ;;  %v97_v12 = vld [vmem:[#allocation2 + $0x190] sm:$0xff]  ;;  %v180_v14 = vadd.f32 %v94_v9, %v93_v8 }
  0x1e   :  { %v98_v13 = vld [vmem:[#allocation2 + $0x198] sm:$0xff]  ;;  %v189_v15 = vadd.f32 %v100_v11, %v99_v10  ;;  %v105_v17 = vld [vmem:[#allocation2 + $0x1d0] sm:$0xff]  ;;  %v103_v21 = vld [vmem:[#allocation2 + $0x1c0] sm:$0xff] }
  0x1f   :  { %139 = vadd.xlane.f32.xlu1 %v138_v24  ;;  %v186_v16 = vadd.f32 %v98_v13, %v97_v12  ;;  %v106_v18 = vld [vmem:[#allocation2 + $0x1d8] sm:$0xff]  ;;  %v101_v19 = vld [vmem:[#allocation2 + $0x1b0] sm:$0xff]  ;;  %v104_v22 = vld [vmem:[#allocation2 + $0x1c8] sm:$0xff] }
  0x20   :  { %121 = vadd.xlane.f32.xlu2 %v120_v25  ;;  %v102_v20 = vld [vmem:[#allocation2 + $0x1b8] sm:$0xff]  ;;  %v198_v23 = vadd.f32 %v106_v18, %v105_v17  ;;  %v195_v25 = vadd.f32 %v104_v22, %v103_v21  ;;  %v107_v28 = vld [vmem:[#allocation2 + $0x1e0] sm:$0xff]  ;;  %v108_v29 = vld [vmem:[#allocation2 + $0x1e8] sm:$0xff] }
  0x21   :  { %136 = vadd.xlane.f32.xlu0 %v135_v26  ;;  %v192_v24 = vadd.f32 %v102_v20, %v101_v19  ;;  %v109_v26 = vld [vmem:[#allocation2 + $0x1f0] sm:$0xff]  ;;  %v110_v27 = vld [vmem:[#allocation2 + $0x1f8] sm:$0xff]  ;;  %v201_v31 = vadd.f32 %v108_v29, %v107_v28  ;;  %v208_v11 = vld [vmem:[#allocation5 + $0x8] sm:$0xff] }
  0x22   :  { %v204_v30 = vadd.f32 %v110_v27, %v109_v26  ;;  %v209_v10 = vld [vmem:[#allocation5 + $0x10] sm:$0xff]  ;;  %v207_v12 = vld [vmem:[#allocation5] sm:$0xff] }
  0x27   :  { %142 = vadd.xlane.f32.xlu1 %v141_v33 }
  0x28   :  { %148 = vadd.xlane.f32.xlu2 %v147_v34 }
  0x29   :  { %133 = vadd.xlane.f32.xlu0 %v132_v35 }
  0x2f   :  { %145 = vadd.xlane.f32.xlu1 %v144_v42 }
  0x30   :  { %154 = vadd.xlane.f32.xlu2 %v153_v43 }
  0x31   :  { %151 = vadd.xlane.f32.xlu0 %v150_v44 }
  0x37   :  { %163 = vadd.xlane.f32.xlu1 %v162_v51 }
  0x38   :  { %157 = vadd.xlane.f32.xlu2 %v156_v52 }
  0x39   :  { %160 = vadd.xlane.f32.xlu0 %v159_v53  ;;  %v504_v53 = vadd.s32 4294967272, %v487_v36 }
  0x3f   :  { %172 = vadd.xlane.f32.xlu1 %v171_v60 }
  0x40   :  { %175 = vadd.xlane.f32.xlu2 %v174_v61 }
  0x41   :  { %166 = vadd.xlane.f32.xlu0 %v165_v62 }
  0x47   :  { %178 = vadd.xlane.f32.xlu1 %v177_v5 }
  0x48   :  { %184 = vadd.xlane.f32.xlu2 %v183_v6  ;;  %v210_v6 = vld [vmem:[#allocation5 + $0x18] sm:$0xff] }
  0x49   :  { %169 = vadd.xlane.f32.xlu0 %v168_v7  ;;  %340 = vmatpush.msra.mxu0 %v210_v6 }
  0x4b   :  { %341 = vmatpush.msra.mxu0 %v209_v10 }
  0x4d   :  { %342 = vmatpush.msra.mxu0 %v208_v11 }
  0x4f   :  { %181 = vadd.xlane.f32.xlu1 %v180_v14  ;;  %343 = vmatpush.msra.mxu0 %v207_v12 }
  0x50   :  { %190 = vadd.xlane.f32.xlu2 %v189_v15 }
  0x51   :  { %187 = vadd.xlane.f32.xlu0 %v186_v16 }
  0x57   :  { %199 = vadd.xlane.f32.xlu1 %v198_v23 }
  0x58   :  { %193 = vadd.xlane.f32.xlu2 %v192_v24 }
  0x59   :  { %196 = vadd.xlane.f32.xlu0 %v195_v25 }
  0x5f   :  { %205 = vadd.xlane.f32.xlu1 %v204_v30 }
  0x61   :  { %202 = vadd.xlane.f32.xlu0 %v201_v31 }
  0x82   :  { %v125_v33 = vpop.xlane.xlu1 %124 }
  0x83   :  { %v119_v34 = vpop.xlane.xlu2 %118  ;;  %v262_v40 = vperm.slane %v125_v33, %v487_v36 }
  0x84   :  { %v113_v35 = vpop.xlane.xlu0 %112  ;;  %v255_v41 = vperm.slane %v119_v34, %v490_v37 }
  0x85   :  { %v249_v45 = vperm.slane %v113_v35, %v487_v36 }
  0x8a   :  { %v128_v39 = vpop.xlane.xlu1 %127 }
  0x8b   :  { %v263_v42 = vperm.slane %v128_v39, %v493_v38  ;;  %v131_v43 = vpop.xlane.xlu2 %130 }
  0x8c   :  { %v116_v44 = vpop.xlane.xlu0 %115  ;;  %v265_v54 = vperm.slane %v131_v43, %v490_v37 }
  0x8d   :  { %v251_v46 = vperm.slane %v116_v44, %v493_v38  ;;  %v264_v47 = vsel %vm252_vm0, %v263_v42, %v262_v40 }
  0x8e   :  { %v266_v60 = vsel %vm256_vm1, %v265_v54, %v264_v47 }
  0x8f   :  { %v253_v48 = vsel %vm252_vm0, %v251_v46, %v249_v45 }
  0x90   :  { %v257_v49 = vsel %vm256_vm1, %v255_v41, %v253_v48 }
  0x92   :  { %v140_v50 = vpop.xlane.xlu1 %139 }
  0x93   :  { %v122_v51 = vpop.xlane.xlu2 %121  ;;  %v270_v21 = vperm.slane %v140_v50, %v493_v38 }
  0x94   :  { %v137_v52 = vpop.xlane.xlu0 %136  ;;  %v259_v55 = vperm.slane %v122_v51, %v504_v53 }
  0x95   :  { %v269_v22 = vperm.slane %v137_v52, %v487_v36 }
  0x96   :  { %v261_v61 = vsel %vm260_vm2, %v259_v55, %v257_v49 }
  0x97   :  { %v271_v34 = vsel %vm252_vm0, %v270_v21, %v269_v22 }
  0x9a   :  { %v143_v56 = vpop.xlane.xlu1 %142 }
  0x9b   :  { %v149_v57 = vpop.xlane.xlu2 %148  ;;  %v272_v23 = vperm.slane %v143_v56, %v490_v37 }
  0x9c   :  { %v134_v58 = vpop.xlane.xlu0 %133  ;;  %v276_v19 = vperm.slane %v149_v57, %v487_v36 }
  0x9d   :  { %v267_v59 = vperm.slane %v134_v58, %v504_v53  ;;  %v273_v42 = vsel %vm256_vm1, %v272_v23, %v271_v34 }
  0x9f   :  { %v268_v62 = vsel %vm260_vm2, %v267_v59, %v266_v60 }
  0xa0   :  { %v312_v63 = vsel %vm311_vm3, %v268_v62, %v261_v61 }
  0xa2   :  { %v146_v0 = vpop.xlane.xlu1 %145 }
  0xa3   :  { %v155_v1 = vpop.xlane.xlu2 %154  ;;  %v274_v25 = vperm.slane %v146_v0, %v504_v53 }
  0xa4   :  { %v152_v2 = vpop.xlane.xlu0 %151  ;;  %v279_v26 = vperm.slane %v155_v1, %v490_v37 }
  0xa5   :  { %v277_v20 = vperm.slane %v152_v2, %v493_v38  ;;  %v275_v45 = vsel %vm260_vm2, %v274_v25, %v273_v42 }
  0xa6   :  { %v314_v58 = vsel %vm313_vm4, %v275_v45, %v312_v63 }
  0xa7   :  { %v278_v27 = vsel %vm252_vm0, %v277_v20, %v276_v19 }
  0xa8   :  { %v280_v46 = vsel %vm256_vm1, %v279_v26, %v278_v27 }
  0xaa   :  { %v164_v3 = vpop.xlane.xlu1 %163 }
  0xab   :  { %v158_v4 = vpop.xlane.xlu2 %157  ;;  %v284_v28 = vperm.slane %v164_v3, %v493_v38 }
  0xac   :  { %v161_v5 = vpop.xlane.xlu0 %160  ;;  %v281_v30 = vperm.slane %v158_v4, %v504_v53 }
  0xad   :  { %v283_v31 = vperm.slane %v161_v5, %v487_v36 }
  0xae   :  { %v282_v49 = vsel %vm260_vm2, %v281_v30, %v280_v46 }
  0xaf   :  { %v285_v50 = vsel %vm252_vm0, %v284_v28, %v283_v31 }
  0xb2   :  { %v173_v7 = vpop.xlane.xlu1 %172 }
  0xb3   :  { %v176_v8 = vpop.xlane.xlu2 %175  ;;  %v290_v35 = vperm.slane %v173_v7, %v487_v36 }
  0xb4   :  { %v167_v9 = vpop.xlane.xlu0 %166  ;;  %v291_v39 = vperm.slane %v176_v8, %v493_v38 }
  0xb5   :  { %v286_v40 = vperm.slane %v167_v9, %v490_v37  ;;  %v375_v9 = vld [vmem:[%s564_s2] ss:$0 sm:$0xff] }
  0xb6   :  { %v292_v54 = vsel %vm252_vm0, %v291_v39, %v290_v35 }
  0xb7   :  { %v287_v55 = vsel %vm256_vm1, %v286_v40, %v285_v50 }
  0xba   :  { %v179_v13 = vpop.xlane.xlu1 %178 }
  0xbb   :  { %v185_v14 = vpop.xlane.xlu2 %184  ;;  %v293_v43 = vperm.slane %v179_v13, %v490_v37 }
  0xbc   :  { %v170_v15 = vpop.xlane.xlu0 %169  ;;  %v297_v32 = vperm.slane %v185_v14, %v487_v36 }
  0xbd   :  { %v288_v44 = vperm.slane %v170_v15, %v504_v53  ;;  %v294_v59 = vsel %vm256_vm1, %v293_v43, %v292_v54 }
  0xbf   :  { %v289_v60 = vsel %vm260_vm2, %v288_v44, %v287_v55 }
  0xc2   :  { %v182_v16 = vpop.xlane.xlu1 %181 }
  0xc3   :  { %v191_v17 = vpop.xlane.xlu2 %190  ;;  %v295_v47 = vperm.slane %v182_v16, %v504_v53 }
  0xc4   :  { %v188_v18 = vpop.xlane.xlu0 %187  ;;  %v300_v48 = vperm.slane %v191_v17, %v490_v37 }
  0xc5   :  { %v298_v33 = vperm.slane %v188_v18, %v493_v38  ;;  %v296_v62 = vsel %vm260_vm2, %v295_v47, %v294_v59 }
  0xc7   :  { %v299_v51 = vsel %vm252_vm0, %v298_v33, %v297_v32 }
  0xc8   :  { %v301_v0 = vsel %vm256_vm1, %v300_v48, %v299_v51 }
  0xca   :  { %v200_v24 = vpop.xlane.xlu1 %199 }
  0xcb   :  { %v194_v41 = vpop.xlane.xlu2 %193  ;;  %v305_v56 = vperm.slane %v200_v24, %v493_v38  ;;  %v316_v38 = vsel %vm315_vm5, %v282_v49, %v314_v58 }
  0xcc   :  { %v197_v29 = vpop.xlane.xlu0 %196  ;;  %v302_v52 = vperm.slane %v194_v41, %v504_v53  ;;  %v318_v3 = vsel %vm317_vm6, %v289_v60, %v316_v38 }
  0xcd   :  { %v304_v57 = vperm.slane %v197_v29, %v487_v36  ;;  %v320_v6 = vsel %vm319_vm7, %v296_v62, %v318_v3 }
  0xce   :  { %v303_v36 = vsel %vm260_vm2, %v302_v52, %v301_v0 }
  0xcf   :  { %v306_v4 = vsel %vm252_vm0, %v305_v56, %v304_v57  ;;  %v322_v8 = vsel %vm321_vm8, %v303_v36, %v320_v6 }
  0xd2   :  { %v206_v61 = vpop.xlane.xlu1 %205 }
  0xd3   :  { %v309_v2 = vperm.slane %v206_v61, %v504_v53 }
  0xd4   :  { %v203_v1 = vpop.xlane.xlu0 %202 }
  0xd5   :  { %v307_v63 = vperm.slane %v203_v1, %v490_v37 }
  0xd7   :  { %v308_v5 = vsel %vm256_vm1, %v307_v63, %v306_v4 }
  0xd8   :  { %v310_v7 = vsel %vm260_vm2, %v309_v2, %v308_v5 }
  0xd9   :  { %v324_v53 = vsel %vm323_vm9, %v310_v7, %v322_v8 }
  0xda   :  { %367 = vmatmul.msk.f32.vlgmr.msra.gmra.mxu0 %vm325_vm10, %v324_v53 }
 0x157   :  { %v345_v37 = vpop.f32.mrf.mxu0 }
 0x158   :  { %v346_v10 = vadd.f32 %v375_v9, %v345_v37 }
 0x15a   :  { %348 = vst [vmem:[#allocation7] sm:$0xff] %v346_v10 }
 0x15b   :  { %359 = dma.vmem_to_hbm [thread:$0]  %s355_s27, 128, %s357_s30, [#allocation4]  }
 0x15c   :  { %452 = dma.done.wait [#allocation4], 128  }
 0x15d   :  { %453 = vsyncadd [#allocation4], 4294967168 }
 0x15e   :  { %364 = vsyncpa [#allocation3], 1 }
 0x15f   :  { %365 = vsyncpa [#allocation6], 1 }
 0x160   :  { %366 = vsyncpa [#allocation4], 1 }

</bundles_post_ra>
